<compile_context>
chip_gen: v7x
topology: tpu7x:2x2x1
jax: 0.10.0
libtpu: 0.0.40
codegen_flags: <defaults>
</compile_context>

<pallas_src>
import functools

import jax
import jax.numpy as jnp
from jax.experimental import pallas as pl
from jax.experimental.pallas import tpu as pltpu

SLOPE = 0.1  # LeakyReLU slope ('lrelu' activation in the PyTorch module)


def _round_up(x, m):
    return ((x + m - 1) // m) * m


def _lrelu(x):
    return jnp.where(x >= 0, x, SLOPE * x)


# -----------------------------------------------------------------------------
# Kernel
# -----------------------------------------------------------------------------
def ivae_fused_kernel(
    x_ref, u_ref, eps_ref,
    w1x_ref, w1u_ref, w2f_ref, w3f_ref,          # fused enc/prior stack weights
    dw1_ref, dw2_ref, dw3_ref,                   # decoder weights
    bias_ref,                                    # (8, 4*hidden) bias slab
    dec_mean_ref, enc_mean_ref, enc_var_ref,     # narrow outputs
    z_ref, prior_mean_ref, prior_var_ref,
    *, data_dim, latent_dim, hidden_dim,
):
    f32 = jnp.float32
    L, H, D = latent_dim, hidden_dim, data_dim
    L4 = 4 * L

    def mm(a, w_ref):
        # MXU matmul with f32 accumulation; input cast to the weight's dtype
        # (bf16 for layers 1-2 when matmul_dtype=bf16, f32 for the final
        # layers whose outputs feed exp()).
        return jnp.dot(a.astype(w_ref.dtype), w_ref[...],
                       preferred_element_type=f32)

    x = x_ref[...]
    u = u_ref[...]
    eps = eps_ref[...].astype(f32)

    # Bias slab rows: b1f | b2f | b3f | dec_b1 | dec_b2 | dec_b3 | pad | pad
    b1f = bias_ref[0:1, :]
    b2f = bias_ref[1:2, :]
    b3f = bias_ref[2:3, 0:L4]
    db1 = bias_ref[3:4, 0:H]
    db2 = bias_ref[4:5, 0:H]
    db3 = bias_ref[5:6, 0:D]

    # ---- fused [enc_mean | enc_log_var | prior_mean | prior_log_var] MLP ----
    h = _lrelu(mm(x, w1x_ref) + mm(u, w1u_ref) + b1f)    # (bb, 4H)
    h = _lrelu(mm(h, w2f_ref) + b2f)                     # (bb, 4H)
    y = mm(h, w3f_ref) + b3f                             # (bb, 4L), f32 matmul

    enc_mean = y[:, 0 * L:1 * L]
    enc_var = jnp.exp(y[:, 1 * L:2 * L]) + 1e-8
    prior_mean = y[:, 2 * L:3 * L]
    prior_var = jnp.exp(y[:, 3 * L:4 * L]) + 1e-8

    # ---- z = encoder_dist.sample(mean, var)  (reparameterization) ----
    # TODO(synk): optional in-kernel eps via pltpu.prng_seed/stateful_normal
    # would remove the eps DMA stream; explicit eps kept for determinism/tests.
    z = eps * jnp.sqrt(enc_var) + enc_mean

    # ---- decoder MLP (sequential on z, cannot be fused with the above) ----
    d = _lrelu(mm(z, dw1_ref) + db1)
    d = _lrelu(mm(d, dw2_ref) + db2)
    dec_mean = mm(d, dw3_ref) + db3                      # (bb, D), f32 matmul

    # ---- direct narrow stores: no packed slab, no zero lanes, no unpack ----
    dec_mean_ref[...] = dec_mean
    enc_mean_ref[...] = enc_mean
    enc_var_ref[...] = enc_var
    z_ref[...] = z
    prior_mean_ref[...] = prior_mean
    prior_var_ref[...] = prior_var


# -----------------------------------------------------------------------------
# Parameter construction (mirrors MLP(__init__) shapes; weights kept (in, out))
# -----------------------------------------------------------------------------
def _xavier_uniform(key, fan_in, fan_out):
    limit = (6.0 / (fan_in + fan_out)) ** 0.5
    return jax.random.uniform(key, (fan_in, fan_out), jnp.float32, -limit, limit)


def _bias(key, fan_in, fan_out):
    limit = 1.0 / (fan_in ** 0.5)
    return jax.random.uniform(key, (1, fan_out), jnp.float32, -limit, limit)


def make_mlp_params(key, in_dim, out_dim, hidden_dim):
    """n_layers=3 MLP: dims = [in, h, h, out]; returns (w1,b1,w2,b2,w3,b3)."""
    dims = [in_dim, hidden_dim, hidden_dim, out_dim]
    params = []
    for i in range(3):
        key, kw, kb = jax.random.split(key, 3)
        params.append(_xavier_uniform(kw, dims[i], dims[i + 1]))
        params.append(_bias(kb, dims[i], dims[i + 1]))
    return tuple(params)


# -----------------------------------------------------------------------------
# Wrapper-side packing of the 30 parameter arrays into lane-dense slabs
# -----------------------------------------------------------------------------
def _pack_params(params, data_dim, aux_dim, latent_dim, hidden_dim, matmul_dtype):
    D, A, L, H = data_dim, aux_dim, latent_dim, hidden_dim
    em = params["encoder_mean"]
    elv = params["encoder_log_var"]
    pm = params["prior_mean"]
    plv = params["prior_log_var"]
    dec = params["decoder"]

    def zeros(r, c):
        return jnp.zeros((r, c), jnp.float32)

    # Layer 1: split into x-rows and u-rows (avoids cat(x,u)).  The prior MLPs
    # only see u, so their x-row blocks are zero.
    w1x = jnp.concatenate([em[0][:D], elv[0][:D], zeros(D, H), zeros(D, H)], axis=1)  # (D, 4H)
    w1u = jnp.concatenate([em[0][D:], elv[0][D:], pm[0], plv[0]], axis=1)             # (A, 4H)
    b1f = jnp.concatenate([em[1], elv[1], pm[1], plv[1]], axis=1)                     # (1, 4H)

    def block_diag(blocks):
        rows = []
        for i, blk in enumerate(blocks):
            row = [blk if j == i else zeros(blk.shape[0], blocks[j].shape[1])
                   for j in range(len(blocks))]
            rows.append(jnp.concatenate(row, axis=1))
        return jnp.concatenate(rows, axis=0)

    w2f = block_diag([em[2], elv[2], pm[2], plv[2]])                                  # (4H, 4H)
    b2f = jnp.concatenate([em[3], elv[3], pm[3], plv[3]], axis=1)                     # (1, 4H)
    w3f = block_diag([em[4], elv[4], pm[4], plv[4]])                                  # (4H, 4L)
    b3f = jnp.concatenate([em[5], elv[5], pm[5], plv[5]], axis=1)                     # (1, 4L)

    W = 4 * H

    def lane_pad(b):
        return jnp.pad(b, ((0, 0), (0, W - b.shape[1])))

    # One (8, 4H) bias slab — exactly one (8,128) VMEM tile for hidden=32.
    bias_slab = jnp.concatenate(
        [lane_pad(b1f), lane_pad(b2f), lane_pad(b3f),
         lane_pad(dec[1]), lane_pad(dec[3]), lane_pad(dec[5]),
         zeros(2, W)], axis=0)

    # Layers 1-2 in matmul_dtype; final layers stay f32 (their outputs feed
    # exp(), which amplifies bf16 relative error in the log-variances).
    weights = (w1x.astype(matmul_dtype), w1u.astype(matmul_dtype),
               w2f.astype(matmul_dtype), w3f.astype(jnp.float32),
               dec[0].astype(matmul_dtype), dec[2].astype(matmul_dtype),
               dec[4].astype(jnp.float32))
    return weights, bias_slab.astype(jnp.float32)


# -----------------------------------------------------------------------------
# Wrapper
# -----------------------------------------------------------------------------
def ivae_forward(x, u, eps, params, *, latent_dim, hidden_dim,
                 block_b=4096, matmul_dtype=jnp.bfloat16):
    """Returns ((dec_mean, dec_var), (enc_mean, enc_var), z, (prior_mean, prior_var)).

    Callers may pass x/u already in bf16 to halve the input DMA stream; the
    kernel casts to the matmul dtype internally either way.
    """
    b, data_dim = x.shape
    aux_dim = u.shape[1]
    L, H = latent_dim, hidden_dim

    # Batch tile.  Per-step VMEM (double-buffered I/O + f32 intermediates) is
    # ~2.2 KB/row, so 4096 rows is ~9 MiB -- under v5e's 16 MiB scoped default
    # and v7x's 32-of-64 MiB, so no vmem_limit override is needed.  Also cap
    # at ceil(b/2) so the grid has >= 2 steps ("parallel" axis can shard over
    # v7x's two TensorCores and the DMA pipeline stays full).
    block_b = max(8, _round_up(min(int(block_b), 4096), 8))
    block_b = min(block_b, max(8, _round_up(-(-b // 2), 8)))
    bp = _round_up(b, block_b)
    if bp != b:
        x = jnp.pad(x, ((0, bp - b), (0, 0)))
        u = jnp.pad(u, ((0, bp - b), (0, 0)))
        eps = jnp.pad(eps, ((0, bp - b), (0, 0)))

    (w1x, w1u, w2f, w3f, dw1, dw2, dw3), bias_slab = _pack_params(
        params, data_dim, aux_dim, L, H, matmul_dtype)

    grid = (bp // block_b,)

    def row_spec(nc):
        return pl.BlockSpec((block_b, nc), lambda i: (i, 0))

    def resident_spec(a):
        # Same block every grid step -> stays VMEM-resident across the grid.
        # (Weight slabs total <100 KB; the redundant second pipeline buffer is
        # negligible, so no pipeline_mode override.)
        return pl.BlockSpec(a.shape, lambda i: (0, 0))

    kernel = functools.partial(
        ivae_fused_kernel, data_dim=data_dim, latent_dim=L, hidden_dim=H)

    # Advisory cost estimate for XLA's scheduler.
    H4, L4 = 4 * H, 4 * L
    weights = (w1x, w1u, w2f, w3f, dw1, dw2, dw3)
    flops = 2 * bp * ((data_dim + aux_dim) * H4 + H4 * H4 + H4 * L4
                      + L * H + H * H + H * data_dim)
    param_bytes = sum(int(w.size) * w.dtype.itemsize for w in weights)
    param_bytes += int(bias_slab.size) * bias_slab.dtype.itemsize
    io_bytes = (int(x.size) * x.dtype.itemsize + int(u.size) * u.dtype.itemsize
                + int(eps.size) * eps.dtype.itemsize
                + bp * (data_dim + 5 * L) * 4)
    cost = pl.CostEstimate(flops=flops, transcendentals=3 * L * bp,
                           bytes_accessed=io_bytes + param_bytes)

    out_shapes = (
        jax.ShapeDtypeStruct((bp, data_dim), jnp.float32),   # dec_mean
        jax.ShapeDtypeStruct((bp, L), jnp.float32),          # enc_mean
        jax.ShapeDtypeStruct((bp, L), jnp.float32),          # enc_var
        jax.ShapeDtypeStruct((bp, L), jnp.float32),          # z
        jax.ShapeDtypeStruct((bp, L), jnp.float32),          # prior_mean
        jax.ShapeDtypeStruct((bp, L), jnp.float32),          # prior_var
    )
    out_specs = (row_spec(data_dim),) + tuple(row_spec(L) for _ in range(5))

    outs = pl.pallas_call(
        kernel,
        out_shape=out_shapes,
        grid_spec=pltpu.PrefetchScalarGridSpec(
            num_scalar_prefetch=0,
            grid=grid,
            in_specs=[
                row_spec(data_dim), row_spec(aux_dim), row_spec(L),
                resident_spec(w1x), resident_spec(w1u),
                resident_spec(w2f), resident_spec(w3f),
                resident_spec(dw1), resident_spec(dw2), resident_spec(dw3),
                resident_spec(bias_slab),
            ],
            out_specs=out_specs,
        ),
        compiler_params=pltpu.CompilerParams(
            dimension_semantics=("parallel",)),
        cost_estimate=cost,
    )(x, u, eps, w1x, w1u, w2f, w3f, dw1, dw2, dw3, bias_slab)

    dec_mean, enc_mean, enc_var, z, prior_mean, prior_var = outs
    if bp != b:  # only slice when batch padding was actually added
        dec_mean, enc_mean, enc_var, z, prior_mean, prior_var = (
            a[:b] for a in (dec_mean, enc_mean, enc_var, z, prior_mean, prior_var))

    # Matches the PyTorch module exactly — decoder_var has size latent_dim.
    dec_var = jnp.full((L,), 0.01, dtype=jnp.float32)
    return (dec_mean, dec_var), (enc_mean, enc_var), z, (prior_mean, prior_var)


# -----------------------------------------------------------------------------
# Pure-JAX reference for correctness check
# -----------------------------------------------------------------------------
def _mlp3_ref(h, p):
    w1, b1, w2, b2, w3, b3 = p
    h = _lrelu(h @ w1 + b1)
    h = _lrelu(h @ w2 + b2)
    return h @ w3 + b3


def ivae_forward_ref(x, u, eps, params):
    xu = jnp.concatenate([x, u], axis=1)
    prior_mean = _mlp3_ref(u, params["prior_mean"])
    prior_var = jnp.exp(_mlp3_ref(u, params["prior_log_var"])) + 1e-8
    enc_mean = _mlp3_ref(xu, params["encoder_mean"])
    enc_var = jnp.exp(_mlp3_ref(xu, params["encoder_log_var"])) + 1e-8
    z = eps * jnp.sqrt(enc_var) + enc_mean
    dec_mean = _mlp3_ref(z, params["decoder"])
    return dec_mean, enc_mean, enc_var, z, prior_mean, prior_var


if __name__ == "__main__":
    # Small shapes consistent with the iVAE module.  hidden=32 makes the fused
    # hidden width exactly 128 lanes; batch=70 exercises the pad/grid path.
    batch = 70
    data_dim = 16
    aux_dim = 8
    latent_dim = 4
    hidden_dim = 32

    root = jax.random.PRNGKey(0)
    kx, ku, keps, kp1, kp2, kp3, kp4, kp5 = jax.random.split(root, 8)

    x = jax.random.normal(kx, (batch, data_dim), jnp.float32)
    u = jax.random.normal(ku, (batch, aux_dim), jnp.float32)
    # eps ~ N(0,1): the stochastic draw of encoder_dist.sample, made deterministic.
    eps = jax.random.normal(keps, (batch, latent_dim), jnp.float32)

    params = {
        "prior_mean":      make_mlp_params(kp1, aux_dim, latent_dim, hidden_dim),
        "prior_log_var":   make_mlp_params(kp2, aux_dim, latent_dim, hidden_dim),
        "encoder_mean":    make_mlp_params(kp3, data_dim + aux_dim, latent_dim, hidden_dim),
        "encoder_log_var": make_mlp_params(kp4, data_dim + aux_dim, latent_dim, hidden_dim),
        "decoder":         make_mlp_params(kp5, latent_dim, data_dim, hidden_dim),
    }

    r_dec, r_em, r_ev, r_z, r_pm, r_pv = ivae_forward_ref(x, u, eps, params)

    # f32 matmul path, small tile (multi-step grid) — tight tolerance.
    fwd = jax.jit(functools.partial(
        ivae_forward, latent_dim=latent_dim, hidden_dim=hidden_dim,
        block_b=16, matmul_dtype=jnp.float32))
    (dec_mean, dec_var), (enc_mean, enc_var), z, (prior_mean, prior_var) = fwd(
        x, u, eps, params)
    jax.block_until_ready(dec_mean)

    for got, ref in [(dec_mean, r_dec), (enc_mean, r_em), (enc_var, r_ev),
                     (z, r_z), (prior_mean, r_pm), (prior_var, r_pv)]:
        assert got.shape == ref.shape and got.dtype == ref.dtype
        assert jnp.allclose(got, ref, rtol=1e-3, atol=1e-3), "mismatch vs reference"

    # Default path: bf16 layer-1/2 matmuls + f32 final layers, default tiling
    # (exercises the grid>=2 clamp) — loose tolerance.
    fwd_def = jax.jit(functools.partial(
        ivae_forward, latent_dim=latent_dim, hidden_dim=hidden_dim))
    (dm2, _), (em2, ev2), z2, (pm2, pv2) = fwd_def(x, u, eps, params)
    jax.block_until_ready(dm2)
    for got, ref in [(dm2, r_dec), (em2, r_em), (ev2, r_ev),
                     (z2, r_z), (pm2, r_pm), (pv2, r_pv)]:
        assert got.shape == ref.shape
        assert jnp.all(jnp.isfinite(got))
        assert jnp.allclose(got, ref, rtol=2e-1, atol=2e-1), "bf16 path mismatch"

    print("KERNEL_OK")
</pallas_src>

<mosaic_0001>
module attributes {stable_mosaic.version = 11 : i64} {
  func.func @ivae_fused_kernel(%arg0: i32, %arg1: memref<16x16xf32, #tpu.memory_space<vmem>>, %arg2: memref<16x8xf32, #tpu.memory_space<vmem>>, %arg3: memref<16x4xf32, #tpu.memory_space<vmem>>, %arg4: memref<16x128xf32, #tpu.memory_space<vmem>>, %arg5: memref<8x128xf32, #tpu.memory_space<vmem>>, %arg6: memref<128x128xf32, #tpu.memory_space<vmem>>, %arg7: memref<128x16xf32, #tpu.memory_space<vmem>>, %arg8: memref<4x32xf32, #tpu.memory_space<vmem>>, %arg9: memref<32x32xf32, #tpu.memory_space<vmem>>, %arg10: memref<32x16xf32, #tpu.memory_space<vmem>>, %arg11: memref<8x128xf32, #tpu.memory_space<vmem>>, %arg12: memref<16x16xf32, #tpu.memory_space<vmem>>, %arg13: memref<16x4xf32, #tpu.memory_space<vmem>>, %arg14: memref<16x4xf32, #tpu.memory_space<vmem>>, %arg15: memref<16x4xf32, #tpu.memory_space<vmem>>, %arg16: memref<16x4xf32, #tpu.memory_space<vmem>>, %arg17: memref<16x4xf32, #tpu.memory_space<vmem>>) attributes {dimension_semantics = [#tpu.dimension_semantics<parallel>], iteration_bounds = array<i64: 5>, scalar_prefetch = 0 : i64, scratch_operands = 0 : i64, tpu.core_type = #tpu.core_type<tc>, window_params = [{transform_indices = @transform_0, window_bounds = array<i64: 16, 16>}, {transform_indices = @transform_1, window_bounds = array<i64: 16, 8>}, {transform_indices = @transform_2, window_bounds = array<i64: 16, 4>}, {pipeline_mode = #tpu.pipeline_mode<synchronous>, transform_indices = @transform_3, window_bounds = array<i64: 16, 128>}, {pipeline_mode = #tpu.pipeline_mode<synchronous>, transform_indices = @transform_4, window_bounds = array<i64: 8, 128>}, {pipeline_mode = #tpu.pipeline_mode<synchronous>, transform_indices = @transform_5, window_bounds = array<i64: 128, 128>}, {pipeline_mode = #tpu.pipeline_mode<synchronous>, transform_indices = @transform_6, window_bounds = array<i64: 128, 16>}, {pipeline_mode = #tpu.pipeline_mode<synchronous>, transform_indices = @transform_7, window_bounds = array<i64: 4, 32>}, {pipeline_mode = #tpu.pipeline_mode<synchronous>, transform_indices = @transform_8, window_bounds = array<i64: 32, 32>}, {pipeline_mode = #tpu.pipeline_mode<synchronous>, transform_indices = @transform_9, window_bounds = array<i64: 32, 16>}, {pipeline_mode = #tpu.pipeline_mode<synchronous>, transform_indices = @transform_10, window_bounds = array<i64: 8, 128>}, {transform_indices = @transform_11, window_bounds = array<i64: 16, 16>}, {transform_indices = @transform_12, window_bounds = array<i64: 16, 4>}, {transform_indices = @transform_13, window_bounds = array<i64: 16, 4>}, {transform_indices = @transform_14, window_bounds = array<i64: 16, 4>}, {transform_indices = @transform_15, window_bounds = array<i64: 16, 4>}, {transform_indices = @transform_16, window_bounds = array<i64: 16, 4>}]} {
    %c0 = arith.constant 0 : index
    %c0_0 = arith.constant 0 : index
    %0 = vector.load %arg1[%c0, %c0_0] : memref<16x16xf32, #tpu.memory_space<vmem>>, vector<16x16xf32>
    %c0_1 = arith.constant 0 : index
    %c0_2 = arith.constant 0 : index
    %1 = vector.load %arg2[%c0_1, %c0_2] : memref<16x8xf32, #tpu.memory_space<vmem>>, vector<16x8xf32>
    %c0_3 = arith.constant 0 : index
    %c0_4 = arith.constant 0 : index
    %2 = vector.load %arg3[%c0_3, %c0_4] : memref<16x4xf32, #tpu.memory_space<vmem>>, vector<16x4xf32>
    %c0_5 = arith.constant 0 : index
    %c0_6 = arith.constant 0 : index
    %3 = vector.load %arg11[%c0_5, %c0_6] : memref<8x128xf32, #tpu.memory_space<vmem>>, vector<1x128xf32>
    %c1 = arith.constant 1 : index
    %c0_7 = arith.constant 0 : index
    %4 = vector.load %arg11[%c1, %c0_7] : memref<8x128xf32, #tpu.memory_space<vmem>>, vector<1x128xf32>
    %c2 = arith.constant 2 : index
    %c0_8 = arith.constant 0 : index
    %5 = vector.load %arg11[%c2, %c0_8] : memref<8x128xf32, #tpu.memory_space<vmem>>, vector<1x16xf32>
    %c3 = arith.constant 3 : index
    %c0_9 = arith.constant 0 : index
    %6 = vector.load %arg11[%c3, %c0_9] : memref<8x128xf32, #tpu.memory_space<vmem>>, vector<1x32xf32>
    %c4 = arith.constant 4 : index
    %c0_10 = arith.constant 0 : index
    %7 = vector.load %arg11[%c4, %c0_10] : memref<8x128xf32, #tpu.memory_space<vmem>>, vector<1x32xf32>
    %c5 = arith.constant 5 : index
    %c0_11 = arith.constant 0 : index
    %8 = vector.load %arg11[%c5, %c0_11] : memref<8x128xf32, #tpu.memory_space<vmem>>, vector<1x16xf32>
    %c0_12 = arith.constant 0 : index
    %c0_13 = arith.constant 0 : index
    %9 = vector.load %arg4[%c0_12, %c0_13] : memref<16x128xf32, #tpu.memory_space<vmem>>, vector<16x128xf32>
    %cst = arith.constant dense<0.000000e+00> : vector<16x128xf32>
    %10 = tpu.matmul %0, %9, %cst {dimension_numbers = #tpu.dot_dimension_numbers<[1], [0], [0], [1], [0, 0, 1, 1], [], []>} : vector<16x16xf32>, vector<16x128xf32>, vector<16x128xf32> -> vector<16x128xf32>
    %c0_14 = arith.constant 0 : index
    %c0_15 = arith.constant 0 : index
    %11 = vector.load %arg5[%c0_14, %c0_15] : memref<8x128xf32, #tpu.memory_space<vmem>>, vector<8x128xf32>
    %cst_16 = arith.constant dense<0.000000e+00> : vector<16x128xf32>
    %12 = tpu.matmul %1, %11, %cst_16 {dimension_numbers = #tpu.dot_dimension_numbers<[1], [0], [0], [1], [0, 0, 1, 1], [], []>} : vector<16x8xf32>, vector<8x128xf32>, vector<16x128xf32> -> vector<16x128xf32>
    %13 = arith.addf %10, %12 : vector<16x128xf32>
    %14 = vector.broadcast %3 : vector<1x128xf32> to vector<16x128xf32>
    %15 = arith.addf %13, %14 : vector<16x128xf32>
    %cst_17 = arith.constant 0.000000e+00 : f32
    %16 = vector.broadcast %cst_17 : f32 to vector<16x128xf32>
    %17 = arith.cmpf oge, %15, %16 : vector<16x128xf32>
    %cst_18 = arith.constant 1.000000e-01 : f32
    %18 = vector.broadcast %cst_18 : f32 to vector<16x128xf32>
    %19 = arith.mulf %18, %15 : vector<16x128xf32>
    %20 = arith.select %17, %15, %19 : vector<16x128xi1>, vector<16x128xf32>
    %c0_19 = arith.constant 0 : index
    %c0_20 = arith.constant 0 : index
    %21 = vector.load %arg6[%c0_19, %c0_20] : memref<128x128xf32, #tpu.memory_space<vmem>>, vector<128x128xf32>
    %cst_21 = arith.constant dense<0.000000e+00> : vector<16x128xf32>
    %22 = tpu.matmul %20, %21, %cst_21 {dimension_numbers = #tpu.dot_dimension_numbers<[1], [0], [0], [1], [0, 0, 1, 1], [], []>} : vector<16x128xf32>, vector<128x128xf32>, vector<16x128xf32> -> vector<16x128xf32>
    %23 = vector.broadcast %4 : vector<1x128xf32> to vector<16x128xf32>
    %24 = arith.addf %22, %23 : vector<16x128xf32>
    %cst_22 = arith.constant 0.000000e+00 : f32
    %25 = vector.broadcast %cst_22 : f32 to vector<16x128xf32>
    %26 = arith.cmpf oge, %24, %25 : vector<16x128xf32>
    %cst_23 = arith.constant 1.000000e-01 : f32
    %27 = vector.broadcast %cst_23 : f32 to vector<16x128xf32>
    %28 = arith.mulf %27, %24 : vector<16x128xf32>
    %29 = arith.select %26, %24, %28 : vector<16x128xi1>, vector<16x128xf32>
    %c0_24 = arith.constant 0 : index
    %c0_25 = arith.constant 0 : index
    %30 = vector.load %arg7[%c0_24, %c0_25] : memref<128x16xf32, #tpu.memory_space<vmem>>, vector<128x16xf32>
    %cst_26 = arith.constant dense<0.000000e+00> : vector<16x16xf32>
    %31 = tpu.matmul %29, %30, %cst_26 {dimension_numbers = #tpu.dot_dimension_numbers<[1], [0], [0], [1], [0, 0, 1, 1], [], []>} : vector<16x128xf32>, vector<128x16xf32>, vector<16x16xf32> -> vector<16x16xf32>
    %32 = vector.broadcast %5 : vector<1x16xf32> to vector<16x16xf32>
    %33 = arith.addf %31, %32 : vector<16x16xf32>
    %34 = vector.extract_strided_slice %33 {offsets = [0, 0], sizes = [16, 4], strides = [1, 1]} : vector<16x16xf32> to vector<16x4xf32>
    %35 = vector.extract_strided_slice %33 {offsets = [0, 4], sizes = [16, 4], strides = [1, 1]} : vector<16x16xf32> to vector<16x4xf32>
    %36 = math.exp %35 : vector<16x4xf32>
    %cst_27 = arith.constant 9.99999993E-9 : f32
    %37 = vector.broadcast %cst_27 : f32 to vector<16x4xf32>
    %38 = arith.addf %36, %37 : vector<16x4xf32>
    %39 = vector.extract_strided_slice %33 {offsets = [0, 8], sizes = [16, 4], strides = [1, 1]} : vector<16x16xf32> to vector<16x4xf32>
    %40 = vector.extract_strided_slice %33 {offsets = [0, 12], sizes = [16, 4], strides = [1, 1]} : vector<16x16xf32> to vector<16x4xf32>
    %41 = math.exp %40 : vector<16x4xf32>
    %cst_28 = arith.constant 9.99999993E-9 : f32
    %42 = vector.broadcast %cst_28 : f32 to vector<16x4xf32>
    %43 = arith.addf %41, %42 : vector<16x4xf32>
    %44 = math.sqrt %38 : vector<16x4xf32>
    %45 = arith.mulf %2, %44 : vector<16x4xf32>
    %46 = arith.addf %45, %34 : vector<16x4xf32>
    %c0_29 = arith.constant 0 : index
    %c0_30 = arith.constant 0 : index
    %47 = vector.load %arg8[%c0_29, %c0_30] : memref<4x32xf32, #tpu.memory_space<vmem>>, vector<4x32xf32>
    %cst_31 = arith.constant dense<0.000000e+00> : vector<16x32xf32>
    %48 = tpu.matmul %46, %47, %cst_31 {dimension_numbers = #tpu.dot_dimension_numbers<[1], [0], [0], [1], [0, 0, 1, 1], [], []>} : vector<16x4xf32>, vector<4x32xf32>, vector<16x32xf32> -> vector<16x32xf32>
    %49 = vector.broadcast %6 : vector<1x32xf32> to vector<16x32xf32>
    %50 = arith.addf %48, %49 : vector<16x32xf32>
    %cst_32 = arith.constant 0.000000e+00 : f32
    %51 = vector.broadcast %cst_32 : f32 to vector<16x32xf32>
    %52 = arith.cmpf oge, %50, %51 : vector<16x32xf32>
    %cst_33 = arith.constant 1.000000e-01 : f32
    %53 = vector.broadcast %cst_33 : f32 to vector<16x32xf32>
    %54 = arith.mulf %53, %50 : vector<16x32xf32>
    %55 = arith.select %52, %50, %54 : vector<16x32xi1>, vector<16x32xf32>
    %c0_34 = arith.constant 0 : index
    %c0_35 = arith.constant 0 : index
    %56 = vector.load %arg9[%c0_34, %c0_35] : memref<32x32xf32, #tpu.memory_space<vmem>>, vector<32x32xf32>
    %cst_36 = arith.constant dense<0.000000e+00> : vector<16x32xf32>
    %57 = tpu.matmul %55, %56, %cst_36 {dimension_numbers = #tpu.dot_dimension_numbers<[1], [0], [0], [1], [0, 0, 1, 1], [], []>} : vector<16x32xf32>, vector<32x32xf32>, vector<16x32xf32> -> vector<16x32xf32>
    %58 = vector.broadcast %7 : vector<1x32xf32> to vector<16x32xf32>
    %59 = arith.addf %57, %58 : vector<16x32xf32>
    %cst_37 = arith.constant 0.000000e+00 : f32
    %60 = vector.broadcast %cst_37 : f32 to vector<16x32xf32>
    %61 = arith.cmpf oge, %59, %60 : vector<16x32xf32>
    %cst_38 = arith.constant 1.000000e-01 : f32
    %62 = vector.broadcast %cst_38 : f32 to vector<16x32xf32>
    %63 = arith.mulf %62, %59 : vector<16x32xf32>
    %64 = arith.select %61, %59, %63 : vector<16x32xi1>, vector<16x32xf32>
    %c0_39 = arith.constant 0 : index
    %c0_40 = arith.constant 0 : index
    %65 = vector.load %arg10[%c0_39, %c0_40] : memref<32x16xf32, #tpu.memory_space<vmem>>, vector<32x16xf32>
    %cst_41 = arith.constant dense<0.000000e+00> : vector<16x16xf32>
    %66 = tpu.matmul %64, %65, %cst_41 {dimension_numbers = #tpu.dot_dimension_numbers<[1], [0], [0], [1], [0, 0, 1, 1], [], []>} : vector<16x32xf32>, vector<32x16xf32>, vector<16x16xf32> -> vector<16x16xf32>
    %67 = vector.broadcast %8 : vector<1x16xf32> to vector<16x16xf32>
    %68 = arith.addf %66, %67 : vector<16x16xf32>
    %c0_42 = arith.constant 0 : index
    %c0_43 = arith.constant 0 : index
    %69 = vector.load %arg12[%c0_42, %c0_43] : memref<16x16xf32, #tpu.memory_space<vmem>>, vector<16x16xf32>
    tpu.vector_store %arg12[%c0_42, %c0_43], %68 {strides = array<i32>} : memref<16x16xf32, #tpu.memory_space<vmem>>, vector<16x16xf32>,
    %c0_44 = arith.constant 0 : index
    %c0_45 = arith.constant 0 : index
    %70 = vector.load %arg13[%c0_44, %c0_45] : memref<16x4xf32, #tpu.memory_space<vmem>>, vector<16x4xf32>
    tpu.vector_store %arg13[%c0_44, %c0_45], %34 {strides = array<i32>} : memref<16x4xf32, #tpu.memory_space<vmem>>, vector<16x4xf32>,
    %c0_46 = arith.constant 0 : index
    %c0_47 = arith.constant 0 : index
    %71 = vector.load %arg14[%c0_46, %c0_47] : memref<16x4xf32, #tpu.memory_space<vmem>>, vector<16x4xf32>
    tpu.vector_store %arg14[%c0_46, %c0_47], %38 {strides = array<i32>} : memref<16x4xf32, #tpu.memory_space<vmem>>, vector<16x4xf32>,
    %c0_48 = arith.constant 0 : index
    %c0_49 = arith.constant 0 : index
    %72 = vector.load %arg15[%c0_48, %c0_49] : memref<16x4xf32, #tpu.memory_space<vmem>>, vector<16x4xf32>
    tpu.vector_store %arg15[%c0_48, %c0_49], %46 {strides = array<i32>} : memref<16x4xf32, #tpu.memory_space<vmem>>, vector<16x4xf32>,
    %c0_50 = arith.constant 0 : index
    %c0_51 = arith.constant 0 : index
    %73 = vector.load %arg16[%c0_50, %c0_51] : memref<16x4xf32, #tpu.memory_space<vmem>>, vector<16x4xf32>
    tpu.vector_store %arg16[%c0_50, %c0_51], %39 {strides = array<i32>} : memref<16x4xf32, #tpu.memory_space<vmem>>, vector<16x4xf32>,
    %c0_52 = arith.constant 0 : index
    %c0_53 = arith.constant 0 : index
    %74 = vector.load %arg17[%c0_52, %c0_53] : memref<16x4xf32, #tpu.memory_space<vmem>>, vector<16x4xf32>
    tpu.vector_store %arg17[%c0_52, %c0_53], %43 {strides = array<i32>} : memref<16x4xf32, #tpu.memory_space<vmem>>, vector<16x4xf32>,
    return
  }
  func.func @transform_0(%arg0: i32) -> (i32, i32) {
    %c0_i32 = arith.constant 0 : i32
    %c0_i32_0 = arith.constant 0 : i32
    return %arg0, %c0_i32 : i32, i32
  }
  func.func @transform_1(%arg0: i32) -> (i32, i32) {
    %c0_i32 = arith.constant 0 : i32
    %c0_i32_0 = arith.constant 0 : i32
    return %arg0, %c0_i32 : i32, i32
  }
  func.func @transform_2(%arg0: i32) -> (i32, i32) {
    %c0_i32 = arith.constant 0 : i32
    %c0_i32_0 = arith.constant 0 : i32
    return %arg0, %c0_i32 : i32, i32
  }
  func.func @transform_3(%arg0: i32) -> (i32, i32) {
    %c0_i32 = arith.constant 0 : i32
    %c0_i32_0 = arith.constant 0 : i32
    %c0_i32_1 = arith.constant 0 : i32
    return %c0_i32, %c0_i32_0 : i32, i32
  }
  func.func @transform_4(%arg0: i32) -> (i32, i32) {
    %c0_i32 = arith.constant 0 : i32
    %c0_i32_0 = arith.constant 0 : i32
    %c0_i32_1 = arith.constant 0 : i32
    return %c0_i32, %c0_i32_0 : i32, i32
  }
  func.func @transform_5(%arg0: i32) -> (i32, i32) {
    %c0_i32 = arith.constant 0 : i32
    %c0_i32_0 = arith.constant 0 : i32
    %c0_i32_1 = arith.constant 0 : i32
    return %c0_i32, %c0_i32_0 : i32, i32
  }
  func.func @transform_6(%arg0: i32) -> (i32, i32) {
    %c0_i32 = arith.constant 0 : i32
    %c0_i32_0 = arith.constant 0 : i32
    %c0_i32_1 = arith.constant 0 : i32
    return %c0_i32, %c0_i32_0 : i32, i32
  }
  func.func @transform_7(%arg0: i32) -> (i32, i32) {
    %c0_i32 = arith.constant 0 : i32
    %c0_i32_0 = arith.constant 0 : i32
    %c0_i32_1 = arith.constant 0 : i32
    return %c0_i32, %c0_i32_0 : i32, i32
  }
  func.func @transform_8(%arg0: i32) -> (i32, i32) {
    %c0_i32 = arith.constant 0 : i32
    %c0_i32_0 = arith.constant 0 : i32
    %c0_i32_1 = arith.constant 0 : i32
    return %c0_i32, %c0_i32_0 : i32, i32
  }
  func.func @transform_9(%arg0: i32) -> (i32, i32) {
    %c0_i32 = arith.constant 0 : i32
    %c0_i32_0 = arith.constant 0 : i32
    %c0_i32_1 = arith.constant 0 : i32
    return %c0_i32, %c0_i32_0 : i32, i32
  }
  func.func @transform_10(%arg0: i32) -> (i32, i32) {
    %c0_i32 = arith.constant 0 : i32
    %c0_i32_0 = arith.constant 0 : i32
    %c0_i32_1 = arith.constant 0 : i32
    return %c0_i32, %c0_i32_0 : i32, i32
  }
  func.func @transform_11(%arg0: i32) -> (i32, i32) {
    %c0_i32 = arith.constant 0 : i32
    %c0_i32_0 = arith.constant 0 : i32
    return %arg0, %c0_i32 : i32, i32
  }
  func.func @transform_12(%arg0: i32) -> (i32, i32) {
    %c0_i32 = arith.constant 0 : i32
    %c0_i32_0 = arith.constant 0 : i32
    return %arg0, %c0_i32 : i32, i32
  }
  func.func @transform_13(%arg0: i32) -> (i32, i32) {
    %c0_i32 = arith.constant 0 : i32
    %c0_i32_0 = arith.constant 0 : i32
    return %arg0, %c0_i32 : i32, i32
  }
  func.func @transform_14(%arg0: i32) -> (i32, i32) {
    %c0_i32 = arith.constant 0 : i32
    %c0_i32_0 = arith.constant 0 : i32
    return %arg0, %c0_i32 : i32, i32
  }
  func.func @transform_15(%arg0: i32) -> (i32, i32) {
    %c0_i32 = arith.constant 0 : i32
    %c0_i32_0 = arith.constant 0 : i32
    return %arg0, %c0_i32 : i32, i32
  }
  func.func @transform_16(%arg0: i32) -> (i32, i32) {
    %c0_i32 = arith.constant 0 : i32
    %c0_i32_0 = arith.constant 0 : i32
    return %arg0, %c0_i32 : i32, i32
  }
}

</mosaic_0001>

<bundles_post_ra>
// kernel: ivae_forward.1
= control target key start
LH: loop header
LB: loop body
LE: loop exit
PB: predicated region body
PF: predicated region fallthrough
CT: control target
= control target key end

     0   :  { %s2030_s21 = smov 0   ;;  %s2255_s0 = inlined_call_operand.vmem [shape: f32[80,16], index: 0, kind: input, shape index: {}]   ;;  %s2256_s1 = inlined_call_operand.vmem [shape: f32[80,8], index: 1, kind: input, shape index: {}]   ;;  %s2257_s2 = inlined_call_operand.vmem [shape: f32[80,4], index: 2, kind: input, shape index: {}]   ;;  %s2258_s3 = inlined_call_operand.vmem [shape: f32[16,128], index: 3, kind: input, shape index: {}]   ;;  %s2259_s4 = inlined_call_operand.vmem [shape: f32[8,128], index: 4, kind: input, shape index: {}]   ;;  %s2260_s5 = inlined_call_operand.vmem [shape: f32[128,128], index: 5, kind: input, shape index: {}]   ;;  %s2261_s6 = inlined_call_operand.vmem [shape: f32[128,16], index: 6, kind: input, shape index: {}]   ;;  %s2262_s7 = inlined_call_operand.vmem [shape: f32[4,32], index: 7, kind: input, shape index: {}]   ;;  %s2263_s8 = inlined_call_operand.vmem [shape: f32[32,32], index: 8, kind: input, shape index: {}]   ;;  %s2264_s9 = inlined_call_operand.vmem [shape: f32[32,16], index: 9, kind: input, shape index: {}]   ;;  %s2265_s10 = inlined_call_operand.vmem [shape: f32[8,128], index: 10, kind: input, shape index: {}]   ;;  %s2266_s11 = inlined_call_operand.vmem [shape: f32[80,16], index: 11, kind: output, shape index: {0}]   ;;  %s2267_s12 = inlined_call_operand.vmem [shape: f32[80,4], index: 12, kind: output, shape index: {1}]   ;;  %s2268_s13 = inlined_call_operand.vmem [shape: f32[80,4], index: 13, kind: output, shape index: {2}]   ;;  %s2269_s14 = inlined_call_operand.vmem [shape: f32[80,4], index: 14, kind: output, shape index: {3}]   ;;  %s2270_s15 = inlined_call_operand.vmem [shape: f32[80,4], index: 15, kind: output, shape index: {4}]   ;;  %s2271_s16 = inlined_call_operand.vmem [shape: f32[80,4], index: 16, kind: output, shape index: {5}]  }
   0x1   :  { %2272 = sst [smem:[#allocation2_spill]] %s2255_s0 }
   0x2 LB: > { %s1620_s22 = sadd.s32 4294967295, %s1940_s21   ;;  %p1624_p0 = scmp.ge.s32.totalorder %s1940_s21, 1  ;;  %s1940_s21 = sphi %s2030_s21, %s27_s21  }
   0x3   : > { %p496_p1 = scmp.lt.s32.totalorder %s1940_s21, 6 }
   0x5   : > { %p497_p2 = pnand %p1624_p0, %p496_p1 }
   0x6   : > { %v649_v0 = vld [vmem:[%s2259_s4] sm:$0xff] (!%p497_p2)  ;;  %s1625_s25 = sshll.u32 (!%p497_p2), %s1620_s22, 1  ;;  %v648_v2 = vld [vmem:[%s2258_s3 + $0x8] sm:$0xff] (!%p497_p2)  ;;  %v828_v6 = vld [vmem:[%s2260_s5 + $0x10] sm:$0xff] (!%p497_p2)  ;;  %vm650_vm0 = vcmask (!%p497_p2), 64512   ;;  %s2273_s20 = sld [smem:[#allocation2_spill]] (!%p497_p2) }
   0x7   : > { %500 = sbr.rel (%p497_p2) target bundleno = 1487 (0x5cf), region = 64  ;;  %v647_v1 = vld [vmem:[%s2258_s3] sm:$0xff] (!%p497_p2)  ;;  %1720 = vmatprep.subr.mxu0 (!%p497_p2), %v649_v0  ;;  %p582_p3 = scmp.lt.s32.totalorder (!%p497_p2), %s1625_s25, 9  ;;  %v827_v5 = vld [vmem:[%s2260_s5 + $0x8] sm:$0xff] (!%p497_p2)  ;;  %v829_v8 = vld [vmem:[%s2260_s5 + $0x18] sm:$0xff] (!%p497_p2)  ;;  %vm732_vm1 = vcmask (!%p497_p2), 130048  }
   0x8   : > { %v1829_v3 = vpack.c.bf16 (!%p497_p2), %v648_v2, %v647_v1  ;;  %v826_v4 = vld [vmem:[%s2260_s5] sm:$0xff] (!%p497_p2)  ;;  %1721 = vmatpush3.msra.mxu0 (!%p497_p2), %v649_v0  ;;  %v1837_v9 = vpack.c.bf16 (!%p497_p2), %v829_v8, %v828_v6  ;;  %v831_v11 = vld [vmem:[%s2260_s5 + $0x28] sm:$0xff] (!%p497_p2)  ;;  %v832_v12 = vld [vmem:[%s2260_s5 + $0x30] sm:$0xff] (!%p497_p2)  ;;  %vm1059_vm6 = vcmask (!%p497_p2), 31744   ;;  %s1942_s18 = smov (!%p497_p2), 124   ;;  %vm1066_vm7 = vcmask (!%p497_p2), 1043456  }
   0x9   : > { %v1833_v7 = vpack.c.bf16 (!%p497_p2), %v827_v5, %v826_v4  ;;  %v830_v10 = vld [vmem:[%s2260_s5 + $0x20] sm:$0xff] (!%p497_p2)  ;;  %v833_v13 = vld [vmem:[%s2260_s5 + $0x38] sm:$0xff] (!%p497_p2)  ;;  %v835_v20 = vld [vmem:[%s2260_s5 + $0x48] sm:$0xff] (!%p497_p2)  ;;  %s1943_s23 = smov (!%p497_p2), 120   ;;  %vm1159_vm14 = vcmask (!%p497_p2), 261120  }
   0xa   : > { %1830 = vmatprep.subr.bf16.mxu0 (!%p497_p2), %v1829_v3  ;;  %v1841_v17 = vpack.c.bf16 (!%p497_p2), %v831_v11, %v830_v10  ;;  %v1845_v18 = vpack.c.bf16 (!%p497_p2), %v833_v13, %v832_v12  ;;  %v834_v19 = vld [vmem:[%s2260_s5 + $0x40] sm:$0xff] (!%p497_p2)  ;;  %v836_v23 = vld [vmem:[%s2260_s5 + $0x50] sm:$0xff] (!%p497_p2)  ;;  %v837_v24 = vld [vmem:[%s2260_s5 + $0x58] sm:$0xff] (!%p497_p2) }
   0xb   : > { %1834 = vmatprep.subr.bf16.mxu1 (!%p497_p2), %v1833_v7  ;;  %v1849_v22 = vpack.c.bf16 (!%p497_p2), %v835_v20, %v834_v19  ;;  %v1853_v25 = vpack.c.bf16 (!%p497_p2), %v837_v24, %v836_v23  ;;  %v838_v26 = vld [vmem:[%s2260_s5 + $0x60] sm:$0xff] (!%p497_p2)  ;;  %v839_v27 = vld [vmem:[%s2260_s5 + $0x68] sm:$0xff] (!%p497_p2)  ;;  %v840_v29 = vld [vmem:[%s2260_s5 + $0x70] sm:$0xff] (!%p497_p2) }
   0xc   : > { %1836 = vmatpush3.bf16.msra.mxu1 (!%p497_p2), %v1833_v7  ;;  %v1857_v28 = vpack.c.bf16 (!%p497_p2), %v839_v27, %v838_v26  ;;  %v841_v30 = vld [vmem:[%s2260_s5 + $0x78] sm:$0xff] (!%p497_p2)  ;;  %v927_v32 = vld [vmem:[%s2261_s6] sm:$0xff] (!%p497_p2)  ;;  %v928_v33 = vld [vmem:[%s2261_s6 + $0x8] sm:$0xff] (!%p497_p2) }
   0xd   : > { %1838 = vmatprep.subr.bf16.mxu1 (!%p497_p2), %v1837_v9  ;;  %v1861_v31 = vpack.c.bf16 (!%p497_p2), %v841_v30, %v840_v29  ;;  %v929_v34 = vld [vmem:[%s2261_s6 + $0x10] sm:$0xff] (!%p497_p2)  ;;  %v1865_v35 = vpack.c.bf16 (!%p497_p2), %v928_v33, %v927_v32  ;;  %v930_v36 = vld [vmem:[%s2261_s6 + $0x18] sm:$0xff] (!%p497_p2)  ;;  %v931_v38 = vld [vmem:[%s2261_s6 + $0x20] sm:$0xff] (!%p497_p2) }
   0xe   : > { %s2275_s25 = smov (!%p582_p3, %s1625_s25), 9  ;;  %v1869_v37 = vpack.c.bf16 %v930_v36, %v929_v34  ;;  %v932_v39 = vld [vmem:[%s2261_s6 + $0x28] sm:$0xff]  ;;  %v933_v41 = vld [vmem:[%s2261_s6 + $0x30] sm:$0xff]  ;;  %v934_v42 = vld [vmem:[%s2261_s6 + $0x38] sm:$0xff] }
   0xf   : > { %s2065_s29 = sshll.u32 %s2275_s25, 3  ;;  %v1873_v40 = vpack.c.bf16 %v932_v39, %v931_v38  ;;  %v1877_v43 = vpack.c.bf16 %v934_v42, %v933_v41  ;;  %v935_v44 = vld [vmem:[%s2261_s6 + $0x40] sm:$0xff]  ;;  %v936_v45 = vld [vmem:[%s2261_s6 + $0x48] sm:$0xff]  ;;  %v937_v47 = vld [vmem:[%s2261_s6 + $0x50] sm:$0xff] }
  0x10   : > { %s591_s17 = scalar_lea.vmem %s2256_s1, %s2065_s29  ;;  %s585_s22 = scalar_lea.vmem %s2273_s20, %s2065_s29  ;;  %1840 = vmatpush3.bf16.msra.mxu1 %v1837_v9  ;;  %v1881_v46 = vpack.c.bf16 %v936_v45, %v935_v44  ;;  %v938_v48 = vld [vmem:[%s2261_s6 + $0x58] sm:$0xff]  ;;  %v1647_v50 = vld [vmem:[%s2265_s10] ss:$0 sm:$0xff]  ;;  %v940_v60 = vld [vmem:[%s2261_s6 + $0x68] sm:$0xff] }
  0x11   : > { %v637_v14 = vld [vmem:[%s591_s17] sm:$0xff]  ;;  %v638_v15 = vld [vmem:[%s591_s17 + $0x8] sm:$0xff]  ;;  %1842 = vmatprep.subr.bf16.mxu1 %v1841_v17  ;;  %v1885_v49 = vpack.c.bf16 %v938_v48, %v937_v47  ;;  %v941_v62 = vld [vmem:[%s2261_s6 + $0x70] sm:$0xff]  ;;  %s609_s17 = scalar_lea.vmem %s2267_s12, %s2065_s29  ;;  %s615_s25 = scalar_lea.vmem %s2268_s13, %s2065_s29 }
  0x12   : > { %v635_v16 = vld [vmem:[%s585_s22] sm:$0xff]  ;;  %1722 = vmatprep.mubr.msk.f32.mxu0 %vm650_vm0, %v637_v14  ;;  %v636_v21 = vld [vmem:[%s585_s22 + $0x8] sm:$0xff]  ;;  %v942_v63 = vld [vmem:[%s2261_s6 + $0x78] sm:$0xff]  ;;  %s1944_s22 = smov 116   ;;  %s627_s30 = scalar_lea.vmem %s2270_s15, %s2065_s29 }
  0x13   : > { %1723 = vmatmul.mubr.msk.f32.vlgmr.msra.gmra.mrb[0].mxu0 %vm650_vm0, %v638_v15  ;;  %v939_v59 = vld [vmem:[%s2261_s6 + $0x60] sm:$0xff]  ;;  %v1893_v0 = vpack.c.bf16 %v942_v63, %v941_v62  ;;  %s621_s26 = scalar_lea.vmem %s2269_s14, %s2065_s29  ;;  %v1152_v47 = vld [vmem:[%s2263_s8 + $0x8] sm:$0xff]  ;;  %s603_s24 = scalar_lea.vmem %s2266_s11, %s2065_s29 }
  0x14   : > { %1832 = vmatpush3.bf16.msra.mxu0 %v1829_v3  ;;  %1729 = vmatprep.mubr.msk.f32.mxu0 %vm732_vm1, %v635_v16  ;;  %v1889_v61 = vpack.c.bf16 %v940_v60, %v939_v59  ;;  %v1648_v1 = vld [vmem:[%s2265_s10 + $0x1] ss:$0 sm:$0xff]  ;;  %v1649_v10 = vld [vmem:[%s2265_s10 + $0x2] ss:$0 sm:$0xff]  ;;  %v1248_v62 = vld [vmem:[%s2264_s9 + $0x8] sm:$0xff] }
  0x15   : > { %1844 = vmatpush3.bf16.msra.mxu1 %v1841_v17  ;;  %1866 = vmatprep.subr.bf16.mxu0 %v1865_v35 }
  0x16   : > { %1846 = vmatprep.subr.bf16.mxu1 %v1845_v18 }
  0x19   : > { %1848 = vmatpush3.bf16.msra.mxu1 %v1845_v18 }
  0x1a   : > { %1850 = vmatprep.subr.bf16.mxu1 %v1849_v22 }
  0x1b   : > { %1730 = vmatmul.mubr.msk.f32.vlgmr.msra.gmra.mrb[0].mxu0 %vm732_vm1, %v636_v21  ;;  %v1054_v21 = vld [vmem:[%s2262_s7] sm:$0xf] }
  0x1c   : > { %1868 = vmatpush3.bf16.msra.mxu0 %v1865_v35 }
  0x1d   : > { %1852 = vmatpush3.bf16.msra.mxu1 %v1849_v22  ;;  %1870 = vmatprep.subr.bf16.mxu0 %v1869_v37 }
  0x1e   : > { %1854 = vmatprep.subr.bf16.mxu1 %v1853_v25 }
  0x20   : > { %1872 = vmatpush3.bf16.msra.mxu0 %v1869_v37 }
  0x21   : > { %1856 = vmatpush3.bf16.msra.mxu1 %v1853_v25  ;;  %1874 = vmatprep.subr.bf16.mxu0 %v1873_v40 }
  0x22   : > { %1858 = vmatprep.subr.bf16.mxu1 %v1857_v28 }
  0x24   : > { %1876 = vmatpush3.bf16.msra.mxu0 %v1873_v40 }
  0x25   : > { %1860 = vmatpush3.bf16.msra.mxu1 %v1857_v28  ;;  %1878 = vmatprep.subr.bf16.mxu0 %v1877_v43 }
  0x26   : > { %1862 = vmatprep.subr.bf16.mxu1 %v1861_v31 }
  0x28   : > { %1880 = vmatpush3.bf16.msra.mxu0 %v1877_v43 }
  0x29   : > { %1864 = vmatpush3.bf16.msra.mxu1 %v1861_v31  ;;  %1882 = vmatprep.subr.bf16.mxu0 %v1881_v46 }
  0x2a   : > { %1802 = vmatprep.subr.msk.mxu1 %vm1066_vm7, %v1054_v21 }
  0x2c   : > { %1884 = vmatpush3.bf16.msra.mxu0 %v1881_v46  ;;  %v1151_v46 = vld [vmem:[%s2263_s8] sm:$0xff] }
  0x2d   : > { %1886 = vmatprep.subr.bf16.mxu0 %v1885_v49  ;;  %v1897_v48 = vpack.c.bf16 %v1152_v47, %v1151_v46 }
  0x30   : > { %1888 = vmatpush3.bf16.msra.mxu0 %v1885_v49  ;;  %v1153_v49 = vld [vmem:[%s2263_s8 + $0x10] sm:$0xff] }
  0x31   : > { %1890 = vmatprep.subr.bf16.mxu0 %v1889_v61 }
  0x34   : > { %1892 = vmatpush3.bf16.msra.mxu0 %v1889_v61  ;;  %v1247_v61 = vld [vmem:[%s2264_s9] sm:$0xff] }
  0x35   : > { %1894 = vmatprep.subr.bf16.mxu0 %v1893_v0  ;;  %v1905_v63 = vpack.c.bf16 %v1248_v62, %v1247_v61 }
  0x38   : > { %1896 = vmatpush3.bf16.msra.mxu0 %v1893_v0  ;;  %v1249_v0 = vld [vmem:[%s2264_s9 + $0x10] sm:$0xff] }
  0x39   : > { %1906 = vmatprep.subr.bf16.mxu0 %v1905_v63 }
  0xee   : > { %v1731_v51 = vpop.f32.mrb[0].mxu0 }
  0xef   : > { %v819_v52 = vadd.f32 %v1731_v51, %v1647_v50  ;;  %v805_v53 = vpop.f32.mrb[1].mxu0 }
  0xf0   : > { %v818_v54 = vadd.f32 %v1647_v50, %v805_v53  ;;  %v1154_v50 = vld [vmem:[%s2263_s8 + $0x18] sm:$0xff] }
  0xf1   : > { %v823_v55 = vmul.f32 0.1, %v819_v52  ;;  %vm821_vm3 = vcmp.ge.f32.partialorder %v819_v52, 0.0  ;;  %v1901_v51 = vpack.c.bf16 %v1154_v50, %v1153_v49 }
  0xf2   : > { %vm820_vm2 = vcmp.ge.f32.partialorder %v818_v54, 0.0  ;;  %v822_v56 = vmul.f32 0.1, %v818_v54 }
  0xf3   : > { %v825_v58 = vsel %vm821_vm3, %v819_v52, %v823_v55  ;;  %v1650_v52 = vld [vmem:[%s2265_s10 + $0x3] ss:$0 sm:$0xff] }
  0xf4   : > { %v824_v57 = vsel %vm820_vm2, %v818_v54, %v822_v56 }
  0xf5   : > { %1764 = vmatprep.mubr.f32.mxu1 %v824_v57 }
  0xf6   : > { %1765 = vmatmul.mubr.f32.vlgmr.msra.gmra.mrb[0].mxu1 %v825_v58 }
  0xf7   : > { %1803 = vmatpush3.msk.msra.mxu1 %vm1066_vm7, %v1054_v21 }
  0xf8   : > { %1898 = vmatprep.subr.bf16.mxu1 %v1897_v48 }
 0x1c9   : > { %v1766_v2 = vpop.f32.mrb[0].mxu1 }
 0x1ca   : > { %v918_v3 = vadd.f32 %v1766_v2, %v1648_v1  ;;  %v912_v4 = vpop.f32.mrb[1].mxu1 }
 0x1cb   : > { %v913_v5 = vadd.f32 %v1648_v1, %v912_v4  ;;  %v1250_v1 = vld [vmem:[%s2264_s9 + $0x18] sm:$0xff] }
 0x1cc   : > { %v924_v6 = vmul.f32 0.1, %v918_v3  ;;  %vm922_vm4 = vcmp.ge.f32.partialorder %v918_v3, 0.0  ;;  %v1909_v2 = vpack.c.bf16 %v1250_v1, %v1249_v0 }
 0x1cd   : > { %v923_v7 = vmul.f32 0.1, %v913_v5  ;;  %vm921_vm5 = vcmp.ge.f32.partialorder %v913_v5, 0.0 }
 0x1ce   : > { %v926_v9 = vsel %vm922_vm4, %v918_v3, %v924_v6  ;;  %v1654_v3 = vld [vmem:[%s2265_s10 + $0x4] ss:$0 sm:$0xff] }
 0x1cf   : > { %v925_v8 = vsel %vm921_vm5, %v913_v5, %v923_v7 }
 0x1d0   : > { %1799 = vmatprep.mubr.f32.mxu0 %v925_v8 }
 0x1d1   : > { %1800 = vmatmul.mubr.f32.vlgmr.msra.gmra.mrb[2].mxu0 %v926_v9 }
 0x1d2   : > { %1908 = vmatpush3.bf16.msra.mxu0 %v1905_v63 }
 0x1d3   : > { %1910 = vmatprep.subr.bf16.mxu0 %v1909_v2 }
 0x1d6   : > { %1912 = vmatpush3.bf16.msra.mxu0 %v1909_v2 }
 0x2a4   : > { %v1801_v11 = vpop.f32.mrb[2].mxu0 }
 0x2a5   : > { %v2168_v12 = vadd.f32 %v1801_v11, %v1649_v10  ;;  %v1013_v13 = vpop.f32.mrb[3].mxu0 }
 0x2a6   : > { %v1014_v14 = vadd.f32 %v1649_v10, %v1013_v13 }
 0x2a7   : > { %v1024_v15 = vmul.f32 1.442695, %v2168_v12  ;;  %1339 = vst.msk [vmem:[%s609_s17 + $0x8] sm:$0xff] %vm1059_vm6, %v2168_v12 }
 0x2a8   : > { %v1022_v16 = vmul.f32 1.442695, %v1014_v14  ;;  %1338 = vst.msk [vmem:[%s609_s17] sm:$0xff] %vm1059_vm6, %v1014_v14 }
 0x2a9   : > { %1926 = vpow2.f32 %v1024_v15 }
 0x2aa   : > { %1928 = vpow2.f32 %v1022_v16 }
 0x2b3   : > { %v1927_v17 = vpop.eup %1926 }
 0x2b4   : > { %v1929_v18 = vpop.eup %1928  ;;  %v1027_v19 = vadd.f32 1e-08, %v1927_v17 }
 0x2b5   : > { %v1026_v20 = vadd.f32 1e-08, %v1929_v18 }
 0x2b6   : > { %1930 = vrsqrt.f32 %v1027_v19  ;;  %vm1037_vm10 = vcmp.eq.f32.partialorder %v1027_v19, inf  ;;  %v1040_v30 = vand.u32 2147483648, %v1027_v19  ;;  %vm1039_vm11 = vcmp.eq.f32.partialorder %v1027_v19, 0.0 }
 0x2b7   : > { %1342 = vrot.lane.b32.xlu1 %v1026_v20, %s1942_s18  ;;  %1932 = vrsqrt.f32 %v1026_v20  ;;  %vm1030_vm8 = vcmp.eq.f32.partialorder %v1026_v20, inf  ;;  %v1033_v26 = vand.u32 2147483648, %v1026_v20  ;;  %vm1032_vm9 = vcmp.eq.f32.partialorder %v1026_v20, 0.0 }
 0x2bb   : > { %1344 = vrot.lane.b32.xlu1 %v1027_v19, %s1942_s18 }
 0x2bf   : > { %1356 = vrot.lane.b32.xlu1 %v2168_v12, %s1943_s23 }
 0x2c0   : > { %v1931_v22 = vpop.eup %1930 }
 0x2c1   : > { %v1933_v23 = vpop.eup %1932  ;;  %v1036_v25 = vmul.f32 %v1931_v22, %v1027_v19 }
 0x2c2   : > { %v1029_v24 = vmul.f32 %v1933_v23, %v1026_v20 }
 0x2c3   : > { %1364 = vrot.lane.b32.xlu1 %v1027_v19, %s1944_s22  ;;  %v1038_v29 = vsel %vm1037_vm10, %v1027_v19, %v1036_v25 }
 0x2c4   : > { %v1031_v27 = vsel %vm1030_vm8, %v1026_v20, %v1029_v24  ;;  %v1041_v31 = vsel %vm1039_vm11, %v1040_v30, %v1038_v29 }
 0x2c5   : > { %v1034_v28 = vsel %vm1032_vm9, %v1033_v26, %v1031_v27 }
 0x2c6   : > { %1044 = vrot.lane.b32.xlu0 %v1034_v28, %s1942_s18 }
 0x2ca   : > { %1046 = vrot.lane.b32.xlu0 %v1041_v31, %s1942_s18  ;;  %s633_s18 = scalar_lea.vmem %s2271_s16, %s2065_s29 }
 0x2ce   : > { %1354 = vrot.lane.b32.xlu0 %v1014_v14, %s1943_s23  ;;  %s597_s23 = scalar_lea.vmem %s2257_s2, %s2065_s29 }
 0x2cf   : > { %v639_v36 = vld [vmem:[%s597_s23] sm:$0xff]  ;;  %v640_v39 = vld [vmem:[%s597_s23 + $0x8] sm:$0xff] }
 0x2d2   : > { %1362 = vrot.lane.b32.xlu0 %v1026_v20, %s1944_s22 }
 0x329   : > { %v1343_v32 = vpop.permute.xlu1 %1342 }
 0x32a   : > { %1348 = vst.msk [vmem:[%s615_s25] sm:$0xff] %vm1059_vm6, %v1343_v32 }
 0x32d   : > { %v1345_v33 = vpop.permute.xlu1 %1344 }
 0x32e   : > { %1349 = vst.msk [vmem:[%s615_s25 + $0x8] sm:$0xff] %vm1059_vm6, %v1345_v33 }
 0x331   : > { %v1357_v34 = vpop.permute.xlu1 %1356 }
 0x332   : > { %1361 = vst.msk [vmem:[%s627_s30 + $0x8] sm:$0xff] %vm1059_vm6, %v1357_v34 }
 0x335   : > { %v1365_v35 = vpop.permute.xlu1 %1364 }
 0x336   : > { %1369 = vst.msk [vmem:[%s633_s18 + $0x8] sm:$0xff] %vm1059_vm6, %v1365_v35 }
 0x338   : > { %v1045_v37 = vpop.permute.xlu0 %1044 }
 0x339   : > { %v1050_v38 = vmul.f32 %v1045_v37, %v639_v36 }
 0x33b   : > { %v1052_v40 = vadd.f32 %v1050_v38, %v1014_v14 }
 0x33c   : > { %v1047_v41 = vpop.permute.xlu0 %1046 }
 0x33d   : > { %1350 = vst.msk [vmem:[%s621_s26] sm:$0xff] %vm1059_vm6, %v1052_v40  ;;  %v1051_v42 = vmul.f32 %v1047_v41, %v640_v39  ;;  %1804 = vmatprep.mubr.msk.f32.mxu1 %vm1059_vm6, %v1052_v40 }
 0x33f   : > { %v1053_v43 = vadd.f32 %v1051_v42, %v2168_v12  ;;  %v1657_v12 = vld [vmem:[%s2265_s10 + $0x5] ss:$0 sm:$0xff] }
 0x340   : > { %v1355_v44 = vpop.permute.xlu0 %1354 }
 0x341   : > { %1351 = vst.msk [vmem:[%s621_s26 + $0x8] sm:$0xff] %vm1059_vm6, %v1053_v43  ;;  %1360 = vst.msk [vmem:[%s627_s30] sm:$0xff] %vm1059_vm6, %v1355_v44  ;;  %1805 = vmatmul.mubr.msk.f32.vlgmr.msra.gmra.mrb[2].mxu1 %vm1059_vm6, %v1053_v43 }
 0x342   : > { %1900 = vmatpush3.bf16.msra.mxu1 %v1897_v48 }
 0x343   : > { %1902 = vmatprep.subr.bf16.mxu1 %v1901_v51 }
 0x344   : > { %v1363_v45 = vpop.permute.xlu0 %1362 }
 0x345   : > { %1368 = vst.msk [vmem:[%s633_s18] sm:$0xff] %vm1059_vm6, %v1363_v45 }
 0x346   : > { %1904 = vmatpush3.bf16.msra.mxu1 %v1901_v51 }
 0x414   : > { %v1806_v53 = vpop.f32.mrb[2].mxu1 }
 0x415   : > { %v1142_v54 = vadd.f32 %v1806_v53, %v1650_v52  ;;  %v1136_v55 = vpop.f32.mrb[3].mxu1 }
 0x416   : > { %v1137_v56 = vadd.f32 %v1650_v52, %v1136_v55 }
 0x417   : > { %v1148_v57 = vmul.f32 0.1, %v1142_v54  ;;  %vm1146_vm12 = vcmp.ge.f32.partialorder %v1142_v54, 0.0 }
 0x418   : > { %vm1145_vm13 = vcmp.ge.f32.partialorder %v1137_v56, 0.0  ;;  %v1147_v58 = vmul.f32 0.1, %v1137_v56 }
 0x419   : > { %v1150_v60 = vsel %vm1146_vm12, %v1142_v54, %v1148_v57 }
 0x41a   : > { %v1149_v59 = vsel %vm1145_vm13, %v1137_v56, %v1147_v58 }
 0x41b   : > { %1815 = vmatprep.mubr.msk.f32.mxu1 %vm1159_vm14, %v1149_v59 }
 0x41c   : > { %1816 = vmatmul.mubr.msk.f32.vlgmr.msra.gmra.mrb[4].mxu1 %vm1159_vm14, %v1150_v60 }
 0x4ef   : > { %v1817_v4 = vpop.f32.mrb[4].mxu1 }
 0x4f0   : > { %v1238_v5 = vadd.f32 %v1817_v4, %v1654_v3  ;;  %v1232_v6 = vpop.f32.mrb[5].mxu1 }
 0x4f1   : > { %v1233_v7 = vadd.f32 %v1654_v3, %v1232_v6 }
 0x4f2   : > { %v1244_v8 = vmul.f32 0.1, %v1238_v5  ;;  %vm1242_vm15 = vcmp.ge.f32.partialorder %v1238_v5, 0.0 }
 0x4f3   : > { %vm1241_vm0 = vcmp.ge.f32.partialorder %v1233_v7, 0.0  ;;  %v1243_v9 = vmul.f32 0.1, %v1233_v7 }
 0x4f4   : > { %v1246_v11 = vsel %vm1242_vm15, %v1238_v5, %v1244_v8 }
 0x4f5   : > { %v1245_v10 = vsel %vm1241_vm0, %v1233_v7, %v1243_v9 }
 0x4f6   : > { %1826 = vmatprep.mubr.msk.f32.mxu0 %vm1159_vm14, %v1245_v10 }
 0x4f7   : > { %1827 = vmatmul.mubr.msk.f32.vlgmr.msra.gmra.mrb[4].mxu0 %vm1159_vm14, %v1246_v11 }
 0x5ca   : > { %v1828_v13 = vpop.f32.mrb[4].mxu0 }
 0x5cb   : > { %v1333_v14 = vadd.f32 %v1828_v13, %v1657_v12  ;;  %v1327_v15 = vpop.f32.mrb[5].mxu0 }
 0x5cc   : > { %v1328_v16 = vadd.f32 %v1657_v12, %v1327_v15 }
 0x5cd   : > { %1337 = vst.msk [vmem:[%s603_s24 + $0x8] sm:$0xff] %vm732_vm1, %v1333_v14 }
 0x5ce   : > { %1336 = vst.msk [vmem:[%s603_s24] sm:$0xff] %vm732_vm1, %v1328_v16 }
 0x5cf PF: > { %s27_s21 = sadd.s32 1, %s1940_s21  }
 0x5d0   : > { %p24_p4 = scmp.ge.s32.totalorder %s27_s21, 7  }
 0x5d2   :  { %26 = sbr.rel (!%p24_p4) target bundleno = 2 (0x2), region = 160 }

</bundles_post_ra>
